<compile_context>
chip_gen: v7x
topology: tpu7x:2x2x1
jax: 0.10.0
libtpu: 0.0.40
codegen_flags: <defaults>
</compile_context>

<pallas_src>
import jax
import jax.numpy as jnp
from jax.experimental import pallas as pl
from jax.experimental.pallas import tpu as pltpu


def _round_up(x, m):
    return ((x + m - 1) // m) * m


# ---------------------------------------------------------------------------
# Kernel
# ---------------------------------------------------------------------------
def _mlp_kernel(x_ref, w1_ref, b1_ref, w2_ref, b2_ref, out_ref):
    # x_ref : (TB, obs)    f32    w1_ref: (obs, H_P)       bf16
    # b1_ref: (1, H_P)     f32    w2_ref: (H_P, n_actions) bf16
    # b2_ref: (1, n_act)   f32    out_ref:(TB, n_actions)  f32
    x = x_ref[...].astype(jnp.bfloat16)
    # Hidden layer on the MXU (bf16 inputs, f32 accumulation).
    h = jnp.dot(x, w1_ref[...], preferred_element_type=jnp.float32)
    # Bias + ReLU in f32 on the VPU.
    h = jnp.maximum(h + b1_ref[...], 0.0)
    # Output layer: re-cast activations to bf16 for the MXU; narrow N.
    o = jnp.dot(h.astype(jnp.bfloat16), w2_ref[...],
                preferred_element_type=jnp.float32)
    out_ref[...] = (o + b2_ref[...]).astype(out_ref.dtype)


# ---------------------------------------------------------------------------
# One-time parameter preparation (hoisted out of the per-call path).
# Call this once per weight update and cache the result.
# ---------------------------------------------------------------------------
def prepare_params(w1, b1, w2, b2):
    """Pad the hidden dim to a lane multiple and cast weights to bf16, once.

    w1: (obs, hidden) f32, b1: (hidden,) f32
    w2: (hidden, n_actions) f32, b2: (n_actions,) f32
    """
    obs, hidden = w1.shape
    n_actions = w2.shape[1]
    H_P = _round_up(hidden, 128)

    # Padded hidden units have zero weight and zero bias; ReLU(0)=0 and the
    # corresponding w2 rows are zero, so they contribute nothing.
    w1_p = jnp.zeros((obs, H_P), jnp.bfloat16).at[:, :hidden].set(
        w1.astype(jnp.bfloat16))
    b1_p = jnp.zeros((1, H_P), jnp.float32).at[0, :hidden].set(
        b1.astype(jnp.float32))
    w2_p = jnp.zeros((H_P, n_actions), jnp.bfloat16).at[:hidden, :].set(
        w2.astype(jnp.bfloat16))
    b2_p = b2.astype(jnp.float32).reshape(1, n_actions)
    return w1_p, b1_p, w2_p, b2_p


def _pick_batch_tiling(B, tile_b):
    """Return (B_P, tile_b) with tight padding and >=2 grid steps for large B."""
    if tile_b is not None:
        # Explicit tile: should be a multiple of 16 (or equal to B).
        return _round_up(B, tile_b), tile_b
    if B <= 256:
        # Latency regime: one full-dim tile, no batch padding at all.
        return B, B
    B_P = _round_up(B, 16)
    cap = min(1024, B_P // 2)          # >=2 steps so both v7x TCs get work
    best = 16
    t = 16
    while t <= cap:
        if B_P % t == 0:
            best = t
        t += 16
    return B_P, best


# ---------------------------------------------------------------------------
# Forward pass
# ---------------------------------------------------------------------------
def net_forward(x, params, *, tile_b=None):
    """x: (B, obs) f32; params: output of prepare_params(); returns (B, n_actions) f32."""
    w1_p, b1_p, w2_p, b2_p = params
    B, obs = x.shape
    H_P = w1_p.shape[1]
    n_actions = w2_p.shape[1]

    B_P, tile_b = _pick_batch_tiling(B, tile_b)

    # Only batch rows ever get padded (cheap, narrow f32 copy); obs columns use
    # the full-array-dim BlockSpec exception, so no column padding of x.
    x_in = x if B_P == B else jnp.pad(x, ((0, B_P - B), (0, 0)))

    grid = (B_P // tile_b,)

    out = pl.pallas_call(
        _mlp_kernel,
        out_shape=jax.ShapeDtypeStruct((B_P, n_actions), jnp.float32),
        grid_spec=pltpu.PrefetchScalarGridSpec(
            num_scalar_prefetch=0,
            grid=grid,
            in_specs=[
                # x tiles stream (and double-buffer) over the batch grid axis.
                pl.BlockSpec((tile_b, obs), lambda i: (i, 0)),
                # Weights/biases: constant block index -> DMA'd once, resident
                # in VMEM for every batch tile.
                pl.BlockSpec((obs, H_P), lambda i: (0, 0)),
                pl.BlockSpec((1, H_P), lambda i: (0, 0)),
                pl.BlockSpec((H_P, n_actions), lambda i: (0, 0)),
                pl.BlockSpec((1, n_actions), lambda i: (0, 0)),
            ],
            # Narrow output block: only the real n_actions columns are stored.
            out_specs=pl.BlockSpec((tile_b, n_actions), lambda i: (i, 0)),
        ),
        compiler_params=pltpu.CompilerParams(
            # Batch tiles are independent -> shard across both TCs on v7x.
            dimension_semantics=("parallel",),
        ),
    )(x_in, w1_p, b1_p, w2_p, b2_p)

    return out if B_P == B else out[:B]


def net_forward_raw(x, w1, b1, w2, b2, *, tile_b=None):
    """Convenience wrapper matching the original signature (preps params inline).
    Prefer prepare_params() + net_forward() in a real training/inference loop."""
    return net_forward(x, prepare_params(w1, b1, w2, b2), tile_b=tile_b)


def reference_forward(x, w1, b1, w2, b2):
    h = jnp.maximum(x @ w1 + b1, 0.0)
    return h @ w2 + b2


if __name__ == "__main__":
    # Small shapes consistent with Net(obs_size, hidden_size, n_actions).
    batch = 2
    obs_size = 8
    hidden_size = 32
    n_actions = 4

    key = jax.random.PRNGKey(0)
    kx, kw1, kb1, kw2, kb2 = jax.random.split(key, 5)

    x = jax.random.normal(kx, (batch, obs_size), dtype=jnp.float32)
    w1 = jax.random.normal(kw1, (obs_size, hidden_size), dtype=jnp.float32) * (1.0 / obs_size) ** 0.5
    b1 = jax.random.normal(kb1, (hidden_size,), dtype=jnp.float32) * 0.01
    w2 = jax.random.normal(kw2, (hidden_size, n_actions), dtype=jnp.float32) * (1.0 / hidden_size) ** 0.5
    b2 = jax.random.normal(kb2, (n_actions,), dtype=jnp.float32) * 0.01

    # One-time parameter prep (cache this across forward calls).
    params = prepare_params(w1, b1, w2, b2)

    out = net_forward(x, params)
    out = jax.block_until_ready(out)

    ref = reference_forward(x, w1, b1, w2, b2)
    assert out.shape == (batch, n_actions)
    # bf16 MXU inputs (f32 accumulation) -> relaxed tolerance vs f32 reference.
    assert jnp.allclose(out, ref, atol=2e-2, rtol=2e-2), "mismatch vs reference"

    print("KERNEL_OK")
</pallas_src>

<mosaic_0001>
module attributes {stable_mosaic.version = 11 : i64} {
  func.func @_mlp_kernel(%arg0: i32, %arg1: memref<2x8xf32, #tpu.memory_space<vmem>>, %arg2: memref<8x128xbf16, #tpu.memory_space<vmem>>, %arg3: memref<1x128xf32, #tpu.memory_space<vmem>>, %arg4: memref<128x4xbf16, #tpu.memory_space<vmem>>, %arg5: memref<1x4xf32, #tpu.memory_space<vmem>>, %arg6: memref<2x4xf32, #tpu.memory_space<vmem>>) attributes {dimension_semantics = [#tpu.dimension_semantics<parallel>], iteration_bounds = array<i64: 1>, scalar_prefetch = 0 : i64, scratch_operands = 0 : i64, tpu.core_type = #tpu.core_type<tc>, window_params = [{transform_indices = @transform_0, window_bounds = array<i64: 2, 8>}, {pipeline_mode = #tpu.pipeline_mode<synchronous>, transform_indices = @transform_1, window_bounds = array<i64: 8, 128>}, {pipeline_mode = #tpu.pipeline_mode<synchronous>, transform_indices = @transform_2, window_bounds = array<i64: 1, 128>}, {pipeline_mode = #tpu.pipeline_mode<synchronous>, transform_indices = @transform_3, window_bounds = array<i64: 128, 4>}, {pipeline_mode = #tpu.pipeline_mode<synchronous>, transform_indices = @transform_4, window_bounds = array<i64: 1, 4>}, {transform_indices = @transform_5, window_bounds = array<i64: 2, 4>}]} {
    %c0 = arith.constant 0 : index
    %c0_0 = arith.constant 0 : index
    %0 = vector.load %arg1[%c0, %c0_0] : memref<2x8xf32, #tpu.memory_space<vmem>>, vector<2x8xf32>
    %1 = arith.truncf %0 : vector<2x8xf32> to vector<2x8xbf16>
    %c0_1 = arith.constant 0 : index
    %c0_2 = arith.constant 0 : index
    %2 = vector.load %arg2[%c0_1, %c0_2] : memref<8x128xbf16, #tpu.memory_space<vmem>>, vector<8x128xbf16>
    %cst = arith.constant dense<0.000000e+00> : vector<2x128xf32>
    %3 = tpu.matmul %1, %2, %cst {dimension_numbers = #tpu.dot_dimension_numbers<[1], [0], [0], [1], [0, 0, 1, 1], [], []>} : vector<2x8xbf16>, vector<8x128xbf16>, vector<2x128xf32> -> vector<2x128xf32>
    %c0_3 = arith.constant 0 : index
    %c0_4 = arith.constant 0 : index
    %4 = vector.load %arg3[%c0_3, %c0_4] : memref<1x128xf32, #tpu.memory_space<vmem>>, vector<1x128xf32>
    %5 = vector.broadcast %4 : vector<1x128xf32> to vector<2x128xf32>
    %6 = arith.addf %3, %5 : vector<2x128xf32>
    %cst_5 = arith.constant 0.000000e+00 : f32
    %7 = vector.broadcast %cst_5 : f32 to vector<2x128xf32>
    %8 = arith.maximumf %6, %7 : vector<2x128xf32>
    %9 = arith.truncf %8 : vector<2x128xf32> to vector<2x128xbf16>
    %c0_6 = arith.constant 0 : index
    %c0_7 = arith.constant 0 : index
    %10 = vector.load %arg4[%c0_6, %c0_7] : memref<128x4xbf16, #tpu.memory_space<vmem>>, vector<128x4xbf16>
    %cst_8 = arith.constant dense<0.000000e+00> : vector<2x4xf32>
    %11 = tpu.matmul %9, %10, %cst_8 {dimension_numbers = #tpu.dot_dimension_numbers<[1], [0], [0], [1], [0, 0, 1, 1], [], []>} : vector<2x128xbf16>, vector<128x4xbf16>, vector<2x4xf32> -> vector<2x4xf32>
    %c0_9 = arith.constant 0 : index
    %c0_10 = arith.constant 0 : index
    %12 = vector.load %arg5[%c0_9, %c0_10] : memref<1x4xf32, #tpu.memory_space<vmem>>, vector<1x4xf32>
    %13 = vector.broadcast %12 : vector<1x4xf32> to vector<2x4xf32>
    %14 = arith.addf %11, %13 : vector<2x4xf32>
    %c0_11 = arith.constant 0 : index
    %c0_12 = arith.constant 0 : index
    %15 = vector.load %arg6[%c0_11, %c0_12] : memref<2x4xf32, #tpu.memory_space<vmem>>, vector<2x4xf32>
    tpu.vector_store %arg6[%c0_11, %c0_12], %14 {strides = array<i32>} : memref<2x4xf32, #tpu.memory_space<vmem>>, vector<2x4xf32>,
    return
  }
  func.func @transform_0(%arg0: i32) -> (i32, i32) {
    %c0_i32 = arith.constant 0 : i32
    %c0_i32_0 = arith.constant 0 : i32
    return %arg0, %c0_i32 : i32, i32
  }
  func.func @transform_1(%arg0: i32) -> (i32, i32) {
    %c0_i32 = arith.constant 0 : i32
    %c0_i32_0 = arith.constant 0 : i32
    %c0_i32_1 = arith.constant 0 : i32
    return %c0_i32, %c0_i32_0 : i32, i32
  }
  func.func @transform_2(%arg0: i32) -> (i32, i32) {
    %c0_i32 = arith.constant 0 : i32
    %c0_i32_0 = arith.constant 0 : i32
    %c0_i32_1 = arith.constant 0 : i32
    return %c0_i32, %c0_i32_0 : i32, i32
  }
  func.func @transform_3(%arg0: i32) -> (i32, i32) {
    %c0_i32 = arith.constant 0 : i32
    %c0_i32_0 = arith.constant 0 : i32
    %c0_i32_1 = arith.constant 0 : i32
    return %c0_i32, %c0_i32_0 : i32, i32
  }
  func.func @transform_4(%arg0: i32) -> (i32, i32) {
    %c0_i32 = arith.constant 0 : i32
    %c0_i32_0 = arith.constant 0 : i32
    %c0_i32_1 = arith.constant 0 : i32
    return %c0_i32, %c0_i32_0 : i32, i32
  }
  func.func @transform_5(%arg0: i32) -> (i32, i32) {
    %c0_i32 = arith.constant 0 : i32
    %c0_i32_0 = arith.constant 0 : i32
    return %arg0, %c0_i32 : i32, i32
  }
}

</mosaic_0001>

<bundles_post_ra>
// kernel: tpu_custom_call.1
= control target key start
LH: loop header
LB: loop body
LE: loop exit
PB: predicated region body
PF: predicated region fallthrough
CT: control target
= control target key end

     0   :  { %vm36_vm0 = vcmask 1043456   ;;  %vm32_vm1 = vcmask 64512   ;;  %v292_v1 = vmov 0.0   ;;  %vm293_vm2 = vmmov 0   ;;  %s373_s0 = inlined_call_operand.vmem [shape: f32[2,8], index: 0, kind: input, shape index: {}]   ;;  %s374_s1 = inlined_call_operand.vmem [shape: bf16[8,128], index: 1, kind: input, shape index: {}]   ;;  %s375_s2 = inlined_call_operand.vmem [shape: f32[1,128], index: 2, kind: input, shape index: {}]   ;;  %s376_s3 = inlined_call_operand.vmem [shape: bf16[128,4], index: 3, kind: input, shape index: {}]   ;;  %s377_s4 = inlined_call_operand.vmem [shape: f32[1,4], index: 4, kind: input, shape index: {}]   ;;  %s378_s5 = inlined_call_operand.hbm [shape: f32[2,4], index: 5, kind: output, shape index: {}]  }
   0x1   :  { %v24_v0 = vld [vmem:[%s374_s1] sm:$0xf]  ;;  %231 = vmatprep.subr.bf16.mxu0 %v292_v1  ;;  %233 = vmatprep.mubr.msk.bf16.mxu0 %vm293_vm2, %v292_v1  ;;  %v261_v6 = vld [vmem:[%s376_s3 + $0x8] sm:$0xff]   ;;  %v262_v7 = vld [vmem:[%s376_s3 + $0x10] sm:$0xff]  }
   0x2   :  { %v38_v2 = vsel %vm36_vm0, %v24_v0, 0  ;;  %v22_v3 = vld [vmem:[%s373_s0] sm:$0x3]  ;;  %237 = vmatprep.subr.bf16.mxu1 %v292_v1  ;;  %253 = vmatprep.mubr.msk.bf16.mxu1 %vm293_vm2, %v292_v1 }
   0x3   :  { %v260_v4 = vld [vmem:[%s376_s3] sm:$0xff]   ;;  %232 = vmatpush3.bf16.msra.mxu0 %v38_v2  ;;  %v23_v5 = vpack.c.bf16 %v22_v3, %v22_v3 }
   0x4   :  { %238 = vmatpush3.bf16.msra.mxu1 %v260_v4 }
   0x5   :  { %239 = vmatprep.subr.bf16.mxu1 %v292_v1 }
   0x6   :  { %234 = vmatmul.mubr.msk.bf16.vlgmr.msra.gmra.mrb[0].mxu0 %vm32_vm1, %v23_v5 }
   0x8   :  { %240 = vmatpush3.bf16.msra.mxu1 %v261_v6 }
   0x9   :  { %241 = vmatprep.subr.bf16.mxu1 %v292_v1 }
   0xa   :  { %10 = vsyncpa [#allocation3], 0  ;;  %v263_v8 = vld [vmem:[%s376_s3 + $0x18] sm:$0xff]   ;;  %v264_v9 = vld [vmem:[%s376_s3 + $0x20] sm:$0xff]   ;;  %s294_s15 = smov [#allocation2]   ;;  %vm193_vm3 = vcmask 25600  }
   0xb   :  { %v265_v10 = vld [vmem:[%s376_s3 + $0x28] sm:$0xff]   ;;  %v266_v11 = vld [vmem:[%s376_s3 + $0x30] sm:$0xff]   ;;  %v267_v12 = vld [vmem:[%s376_s3 + $0x38] sm:$0xff]   ;;  %s201_s16 = sshll.u32 %s294_s15, 4  ;;  %s202_s16 = int_to_ptr.vmem [resolvable:$true] %s201_s16 }
   0xc   :  { %242 = vmatpush3.bf16.msra.mxu1 %v262_v7  ;;  %v209_v13 = vld [vmem:[%s375_s2] ss:$0 sm:$0xff]  ;;  %s268_s2 = scalar_lea.vmem %s202_s16, 32  ;;  %p273_p1 = scmp.lt.s32.totalorder %s202_s16, %s202_s16 }
   0xd   :  { %243 = vmatprep.subr.bf16.mxu1 %v292_v1  ;;  %v211_v21 = vld [vmem:[%s377_s4] ss:$0 sm:$0xff]  ;;  %p269_p0 = scmp.ne.s32.totalorder %s202_s16, %s268_s2  ;;  %p274_p2 = scmp.lt.s32.totalorder %s268_s2, %s268_s2 }
   0xf   :  { %p275_p3 = por %p274_p2, %p273_p1 }
  0x10   :  { %244 = vmatpush3.bf16.msra.mxu1 %v263_v8 }
  0x11   :  { %245 = vmatprep.subr.bf16.mxu1 %v292_v1  ;;  %p276_p4 = pnand %p275_p3, %p269_p0 }
  0x14   :  { %246 = vmatpush3.bf16.msra.mxu1 %v264_v9 }
  0x15   :  { %247 = vmatprep.subr.bf16.mxu1 %v292_v1 }
  0x18   :  { %248 = vmatpush3.bf16.msra.mxu1 %v265_v10 }
  0x19   :  { %249 = vmatprep.subr.bf16.mxu1 %v292_v1 }
  0x1c   :  { %250 = vmatpush3.bf16.msra.mxu1 %v266_v11 }
  0x1d   :  { %251 = vmatprep.subr.bf16.mxu1 %v292_v1 }
  0x20   :  { %252 = vmatpush3.bf16.msra.mxu1 %v267_v12 }
  0xd9   :  { %v74_v14 = vpop.f32.mrb[0].mxu0 }
  0xda   :  { %v75_v15 = vadd.f32 %v209_v13, %v74_v14  ;;  %v235_v16 = vpop.f32.mrb[1].mxu0 }
  0xdb   :  { %v77_v17 = vpop.f32.mrb[2].mxu0 }
  0xdc   :  { %v80_v18 = vmax.f32 %v75_v15, 0.0  ;;  %v236_v19 = vpop.f32.mrb[3].mxu0 }
  0xde   :  { %v81_v20 = vpack.c.bf16 %v80_v18, %v80_v18 }
  0xe0   :  { %254 = vmatmul.mubr.bf16.vlgmr.msra.gmra.mrb[0].mxu1 %v81_v20 }
 0x1b3   :  { %v187_v22 = vpop.f32.mrb[0].mxu1 }
 0x1b4   :  { %v188_v23 = vadd.f32 %v211_v21, %v187_v22  ;;  %v255_v24 = vpop.f32.mrb[1].mxu1 }
 0x1b5   :  { %v190_v25 = vpop.f32.mrb[2].mxu1 }
 0x1b6   :  { %v256_v26 = vpop.f32.mrb[3].mxu1  ;;  %194 = vst.msk [vmem:[#allocation2] sm:$0x3] %vm193_vm3, %v188_v23 }
 0x1b7   :  { %279 = shalt.err (!%p276_p4)
}
 0x1b8   :  { %s280_s4 = scalar_lea.hbm %s378_s5, 32 }
 0x1b9   :  { %p281_p5 = scmp.ne.s32.totalorder %s378_s5, %s280_s4  ;;  %p284_p6 = scmp.lt.u32.totalorder %s280_s4, %s378_s5 }
 0x1bb   :  { %p286_p7 = pnand %p284_p6, %p281_p5 }
 0x1bd   :  { %289 = shalt.err (!%p286_p7)
}
 0x1be   :  { %204 = dma.vmem_to_hbm [thread:$0]  %s202_s16, 32, %s378_s5, [#allocation3]  }
 0x1bf   :  { %290 = dma.done.wait [#allocation3], 32  }
 0x1c0   :  { %291 = vsyncadd [#allocation3], 4294967264 }
 0x1c1   :  { %208 = vsyncpa [#allocation3], 1 }

</bundles_post_ra>
